<compile_context>
chip_gen: v7x
topology: tpu7x:2x2x1
jax: 0.10.0
libtpu: 0.0.40
codegen_flags: <defaults>
</compile_context>

<pallas_src>
import functools

import jax
import jax.numpy as jnp
from jax.experimental import pallas as pl
from jax.experimental.pallas import tpu as pltpu


_MIB = 1024 * 1024
_DEFAULT_BLOCK_CAP = 4 * _MIB       # per x block (2-8 MiB is the sweet spot)
_SPLIT_BLOCK_HARD_CAP = 16 * _MIB   # max row block for the split (large-HW) path
_MIN_GRID_STEPS = 8                 # target steps for pipelining / 2-TC sharding


def _vmem_capacity_bytes():
    try:
        return int(pltpu.get_tpu_info().vmem_capacity_bytes)
    except Exception:
        return 64 * _MIB  # conservative (v7x per-TC)


def _vmem_limit_bytes(block_bytes):
    # 2x(in+out) double-buffered blocks + f32 temporaries + weights + slack.
    need = 8 * block_bytes + 4 * _MIB
    cap = _vmem_capacity_bytes()
    return int(min(max(32 * _MIB, need), max(32 * _MIB, cap - 16 * _MIB)))


def _choose_tile(total, per_unit_bytes, cap_bytes, min_steps, multiple_of=1):
    """Largest divisor of `total` (multiple of `multiple_of`) whose block fits
    `cap_bytes`, preferring enough grid steps for pipelining.  None if no
    divisor fits the cap."""
    divs = set()
    i = 1
    while i * i <= total:
        if total % i == 0:
            divs.add(i)
            divs.add(total // i)
        i += 1
    divs = sorted(d for d in divs if d % multiple_of == 0)
    feasible = [d for d in divs if d * per_unit_bytes <= cap_bytes]
    if not feasible:
        return None
    steps_target = min(min_steps, total // min(feasible))
    good = [d for d in feasible if total // d >= steps_target]
    return max(good) if good else max(feasible)


# ---------------------------------------------------------------------------
# Fused single-pass kernel: pool + excite + scale on a (bt, C, HW) block.
# ---------------------------------------------------------------------------
def _fused_se_kernel(x_ref, w1t_ref, w2t_ref, o_ref, *, inv_hw):
    # x_ref/o_ref: (bt, C, HW); w1t_ref: (C, Cr) f32; w2t_ref: (Cr, C) f32.
    x = x_ref[...]
    # Squeeze: global average pool over the spatial (lane) axis, f32 accum.
    pooled = jnp.sum(x, axis=-1, dtype=jnp.float32) * inv_hw            # (bt, C)
    # Excite: Linear -> ReLU -> Linear -> Hsigmoid, all f32 (tiny vs DMA).
    h = jnp.maximum(
        jnp.dot(pooled, w1t_ref[...], preferred_element_type=jnp.float32), 0.0)
    y = jnp.dot(h, w2t_ref[...], preferred_element_type=jnp.float32)     # (bt, C)
    y = jnp.clip(y + 3.0, 0.0, 6.0) * (1.0 / 6.0)                        # Hsigmoid
    # Scale: lane-broadcast multiply, single cast on store.
    o_ref[...] = (x * y[:, :, None]).astype(o_ref.dtype)


def _se_fused(x, w1t, w2t, bt, inv_hw):
    B, C, H, W = x.shape
    HW = H * W
    Cr = w1t.shape[1]
    x3 = x.reshape(B, C, HW)                       # free reshape (contiguous)
    n_blocks = B // bt
    block_bytes = bt * C * HW * jnp.dtype(x.dtype).itemsize

    out3 = pl.pallas_call(
        functools.partial(_fused_se_kernel, inv_hw=inv_hw),
        out_shape=jax.ShapeDtypeStruct((B, C, HW), x.dtype),
        grid_spec=pltpu.PrefetchScalarGridSpec(
            num_scalar_prefetch=0,
            grid=(n_blocks,),
            in_specs=[
                pl.BlockSpec((bt, C, HW), lambda b: (b, 0, 0)),
                pl.BlockSpec((C, Cr), lambda b: (0, 0)),
                pl.BlockSpec((Cr, C), lambda b: (0, 0)),
            ],
            out_specs=pl.BlockSpec((bt, C, HW), lambda b: (b, 0, 0)),
        ),
        compiler_params=pltpu.CompilerParams(
            dimension_semantics=("parallel",),
            vmem_limit_bytes=_vmem_limit_bytes(block_bytes),
        ),
    )(x3, w1t, w2t)
    return out3.reshape(B, C, H, W)


# ---------------------------------------------------------------------------
# Split path for large (C, HW) slabs: pool pass + tiny XLA excite + scale pass.
# ---------------------------------------------------------------------------
def _pool_rows_kernel(x_ref, p_ref, *, inv_hw):
    # x_ref: (rows, HW); p_ref: (rows, 1) f32.
    p_ref[...] = jnp.sum(x_ref[...], axis=-1, keepdims=True,
                         dtype=jnp.float32) * inv_hw


def _scale_rows_kernel(x_ref, y_ref, o_ref):
    # x_ref/o_ref: (rows, HW); y_ref: (rows, 1) f32.
    o_ref[...] = (x_ref[...] * y_ref[...]).astype(o_ref.dtype)


def _se_split(x, w1t, w2t, rows, inv_hw):
    B, C, H, W = x.shape
    HW = H * W
    dtype = x.dtype
    x2 = x.reshape(B * C, HW)                      # free reshape (contiguous)
    n_blocks = (B * C) // rows
    block_bytes = rows * HW * jnp.dtype(dtype).itemsize
    vmem_limit = _vmem_limit_bytes(block_bytes)

    # Pass 1: per-(image, channel) spatial mean with f32 accumulation.
    pooled = pl.pallas_call(
        functools.partial(_pool_rows_kernel, inv_hw=inv_hw),
        out_shape=jax.ShapeDtypeStruct((B * C, 1), jnp.float32),
        grid_spec=pltpu.PrefetchScalarGridSpec(
            num_scalar_prefetch=0,
            grid=(n_blocks,),
            in_specs=[pl.BlockSpec((rows, HW), lambda r: (r, 0))],
            out_specs=pl.BlockSpec((rows, 1), lambda r: (r, 0)),
        ),
        compiler_params=pltpu.CompilerParams(
            dimension_semantics=("parallel",),
            vmem_limit_bytes=vmem_limit,
        ),
    )(x2)

    # Excite on the tiny (B, C) pooled tensor in plain XLA (negligible cost).
    p = pooled.reshape(B, C)
    h = jnp.maximum(p @ w1t, 0.0)
    y = jnp.clip(h @ w2t + 3.0, 0.0, 6.0) * (1.0 / 6.0)
    y2 = y.reshape(B * C, 1)

    # Pass 2: broadcast-scale each row.
    out2 = pl.pallas_call(
        _scale_rows_kernel,
        out_shape=jax.ShapeDtypeStruct((B * C, HW), dtype),
        grid_spec=pltpu.PrefetchScalarGridSpec(
            num_scalar_prefetch=0,
            grid=(n_blocks,),
            in_specs=[pl.BlockSpec((rows, HW), lambda r: (r, 0)),
                      pl.BlockSpec((rows, 1), lambda r: (r, 0))],
            out_specs=pl.BlockSpec((rows, HW), lambda r: (r, 0)),
        ),
        compiler_params=pltpu.CompilerParams(
            dimension_semantics=("parallel",),
            vmem_limit_bytes=vmem_limit,
        ),
    )(x2, y2)
    return out2.reshape(B, C, H, W)


# ---------------------------------------------------------------------------
# Public wrapper.
# ---------------------------------------------------------------------------
def se_module(x, w1, w2, *, block_cap_bytes=_DEFAULT_BLOCK_CAP):
    """SEModule forward.  x: (B, C, H, W); w1: (Cr, C); w2: (C, Cr).

    Matches: y = hsigmoid(relu(mean(x, HW) @ w1.T) @ w2.T); out = x * y.
    (Both Linears are bias-free, as in the PyTorch spec.)
    """
    B, C, H, W = x.shape
    HW = H * W
    itemsize = jnp.dtype(x.dtype).itemsize
    inv_hw = 1.0 / float(HW)

    # Pre-transpose / pre-cast the tiny excite weights once (hoisted out of
    # the kernel; matmul cost is negligible vs the HBM stream).
    w1t = w1.T.astype(jnp.float32)   # (C, Cr)
    w2t = w2.T.astype(jnp.float32)   # (Cr, C)

    per_image_bytes = C * HW * itemsize

    # Preferred: one fused pass over x in its native layout.
    bt = _choose_tile(B, per_image_bytes, block_cap_bytes, _MIN_GRID_STEPS)
    if bt is not None:
        return _se_fused(x, w1t, w2t, bt, inv_hw)

    # Per-image slab too large for the block budget: split over (B*C, HW) rows.
    rows = None
    if (B * C) % 8 == 0:
        rows = (_choose_tile(B * C, HW * itemsize, block_cap_bytes,
                             _MIN_GRID_STEPS, multiple_of=8)
                or _choose_tile(B * C, HW * itemsize, _SPLIT_BLOCK_HARD_CAP,
                                _MIN_GRID_STEPS, multiple_of=8))
    if rows is not None:
        return _se_split(x, w1t, w2t, rows, inv_hw)

    # TODO(synk): B*C not a multiple of 8 (or HW extreme) — fall back to one
    # whole-image block per step; may need a large VMEM limit for huge H*W.
    return _se_fused(x, w1t, w2t, 1, inv_hw)


# ---------------------------------------------------------------------------
# Reference + tests.
# ---------------------------------------------------------------------------
def se_module_ref(x, w1, w2):
    xf = x.astype(jnp.float32)
    y = jnp.mean(xf, axis=(2, 3))                                  # (B, C)
    y = jnp.maximum(y @ w1.T.astype(jnp.float32), 0.0)             # (B, Cr)
    y = y @ w2.T.astype(jnp.float32)                               # (B, C)
    y = jnp.clip(y + 3.0, 0.0, 6.0) / 6.0
    return xf * y[:, :, None, None]


def _run_case(key, B, C, H, W, reduction, dtype=jnp.float32,
              block_cap_bytes=_DEFAULT_BLOCK_CAP, atol=1e-5, rtol=1e-5):
    Cr = max(1, C // reduction)
    kx, k1, k2 = jax.random.split(key, 3)
    x = jax.random.normal(kx, (B, C, H, W), dtype=jnp.float32).astype(dtype)
    w1 = (jax.random.normal(k1, (Cr, C), dtype=jnp.float32) * 0.5).astype(dtype)
    w2 = (jax.random.normal(k2, (C, Cr), dtype=jnp.float32) * 0.5).astype(dtype)

    out = se_module(x, w1, w2, block_cap_bytes=block_cap_bytes)
    out = jax.block_until_ready(out)
    ref = se_module_ref(x, w1, w2)
    assert out.shape == (B, C, H, W)
    assert out.dtype == dtype
    err = float(jnp.max(jnp.abs(out.astype(jnp.float32) - ref)))
    assert jnp.allclose(out.astype(jnp.float32), ref, atol=atol, rtol=rtol), err


if __name__ == "__main__":
    key = jax.random.PRNGKey(0)
    k1, k2, k3, k4, k5 = jax.random.split(key, 5)

    # Primary (module-spec) shape: fused path, native layout.
    _run_case(k1, B=2, C=4, H=16, W=16, reduction=4)

    # Real-ish SE shape (C >> HW, HW not a 128-multiple) — no HBM transpose.
    _run_case(k2, B=2, C=96, H=7, W=7, reduction=4)

    # Larger batch: exercises a multi-step (>= 8) pipelined grid.
    _run_case(k3, B=8, C=8, H=16, W=16, reduction=4)

    # Force the split (pool + excite + scale) path with a tiny block budget.
    _run_case(k4, B=2, C=16, H=16, W=16, reduction=4,
              block_cap_bytes=8 * 1024)

    # bf16 I/O path (f32 accumulation / scale math inside the kernel).
    _run_case(k5, B=2, C=8, H=8, W=16, reduction=4, dtype=jnp.bfloat16,
              atol=5e-2, rtol=5e-2)

    print("KERNEL_OK")
</pallas_src>

<mosaic_0001>
module attributes {stable_mosaic.version = 11 : i64} {
  func.func @_fused_se_kernel(%arg0: i32, %arg1: memref<1x4x256xf32, #tpu.memory_space<vmem>>, %arg2: memref<4x1xf32, #tpu.memory_space<vmem>>, %arg3: memref<1x4xf32, #tpu.memory_space<vmem>>, %arg4: memref<1x4x256xf32, #tpu.memory_space<vmem>>) attributes {dimension_semantics = [#tpu.dimension_semantics<parallel>], iteration_bounds = array<i64: 2>, scalar_prefetch = 0 : i64, scratch_operands = 0 : i64, tpu.core_type = #tpu.core_type<tc>, window_params = [{transform_indices = @transform_0, window_bounds = array<i64: 1, 4, 256>}, {pipeline_mode = #tpu.pipeline_mode<synchronous>, transform_indices = @transform_1, window_bounds = array<i64: 4, 1>}, {pipeline_mode = #tpu.pipeline_mode<synchronous>, transform_indices = @transform_2, window_bounds = array<i64: 1, 4>}, {transform_indices = @transform_3, window_bounds = array<i64: 1, 4, 256>}]} {
    %c0 = arith.constant 0 : index
    %c0_0 = arith.constant 0 : index
    %c0_1 = arith.constant 0 : index
    %0 = vector.load %arg1[%c0, %c0_0, %c0_1] : memref<1x4x256xf32, #tpu.memory_space<vmem>>, vector<1x4x256xf32>
    %cst = arith.constant dense<0.000000e+00> : vector<1x4xf32>
    %1 = vector.multi_reduction <add>, %0, %cst [2] : vector<1x4x256xf32> to vector<1x4xf32>
    %cst_2 = arith.constant 3.906250e-03 : f32
    %2 = vector.broadcast %cst_2 : f32 to vector<1x4xf32>
    %3 = arith.mulf %1, %2 : vector<1x4xf32>
    %c0_3 = arith.constant 0 : index
    %c0_4 = arith.constant 0 : index
    %4 = vector.load %arg2[%c0_3, %c0_4] : memref<4x1xf32, #tpu.memory_space<vmem>>, vector<4x1xf32>
    %cst_5 = arith.constant dense<0.000000e+00> : vector<1x1xf32>
    %5 = tpu.matmul %3, %4, %cst_5 {dimension_numbers = #tpu.dot_dimension_numbers<[1], [0], [0], [1], [0, 0, 1, 1], [], []>} : vector<1x4xf32>, vector<4x1xf32>, vector<1x1xf32> -> vector<1x1xf32>
    %cst_6 = arith.constant 0.000000e+00 : f32
    %6 = vector.broadcast %cst_6 : f32 to vector<1x1xf32>
    %7 = arith.maximumf %5, %6 : vector<1x1xf32>
    %c0_7 = arith.constant 0 : index
    %c0_8 = arith.constant 0 : index
    %8 = vector.load %arg3[%c0_7, %c0_8] : memref<1x4xf32, #tpu.memory_space<vmem>>, vector<1x4xf32>
    %cst_9 = arith.constant dense<0.000000e+00> : vector<1x4xf32>
    %9 = tpu.matmul %7, %8, %cst_9 {dimension_numbers = #tpu.dot_dimension_numbers<[1], [0], [0], [1], [0, 0, 1, 1], [], []>} : vector<1x1xf32>, vector<1x4xf32>, vector<1x4xf32> -> vector<1x4xf32>
    %cst_10 = arith.constant 3.000000e+00 : f32
    %10 = vector.broadcast %cst_10 : f32 to vector<1x4xf32>
    %11 = arith.addf %9, %10 : vector<1x4xf32>
    %cst_11 = arith.constant 0.000000e+00 : f32
    %cst_12 = arith.constant 6.000000e+00 : f32
    %12 = vector.broadcast %cst_11 : f32 to vector<1x4xf32>
    %13 = arith.maximumf %12, %11 : vector<1x4xf32>
    %14 = vector.broadcast %cst_12 : f32 to vector<1x4xf32>
    %15 = arith.minimumf %14, %13 : vector<1x4xf32>
    %cst_13 = arith.constant 0.166666672 : f32
    %16 = vector.broadcast %cst_13 : f32 to vector<1x4xf32>
    %17 = arith.mulf %15, %16 : vector<1x4xf32>
    %18 = vector.shape_cast %17 : vector<1x4xf32> to vector<1x4x1xf32>
    %19 = vector.broadcast %18 : vector<1x4x1xf32> to vector<1x4x256xf32>
    %20 = arith.mulf %0, %19 : vector<1x4x256xf32>
    %c0_14 = arith.constant 0 : index
    %c0_15 = arith.constant 0 : index
    %c0_16 = arith.constant 0 : index
    %21 = vector.load %arg4[%c0_14, %c0_15, %c0_16] : memref<1x4x256xf32, #tpu.memory_space<vmem>>, vector<1x4x256xf32>
    tpu.vector_store %arg4[%c0_14, %c0_15, %c0_16], %20 {strides = array<i32>} : memref<1x4x256xf32, #tpu.memory_space<vmem>>, vector<1x4x256xf32>,
    return
  }
  func.func @transform_0(%arg0: i32) -> (i32, i32, i32) {
    %c0_i32 = arith.constant 0 : i32
    %c0_i32_0 = arith.constant 0 : i32
    %c0_i32_1 = arith.constant 0 : i32
    return %arg0, %c0_i32, %c0_i32_0 : i32, i32, i32
  }
  func.func @transform_1(%arg0: i32) -> (i32, i32) {
    %c0_i32 = arith.constant 0 : i32
    %c0_i32_0 = arith.constant 0 : i32
    %c0_i32_1 = arith.constant 0 : i32
    return %c0_i32, %c0_i32_0 : i32, i32
  }
  func.func @transform_2(%arg0: i32) -> (i32, i32) {
    %c0_i32 = arith.constant 0 : i32
    %c0_i32_0 = arith.constant 0 : i32
    %c0_i32_1 = arith.constant 0 : i32
    return %c0_i32, %c0_i32_0 : i32, i32
  }
  func.func @transform_3(%arg0: i32) -> (i32, i32, i32) {
    %c0_i32 = arith.constant 0 : i32
    %c0_i32_0 = arith.constant 0 : i32
    %c0_i32_1 = arith.constant 0 : i32
    return %arg0, %c0_i32, %c0_i32_0 : i32, i32, i32
  }
}

</mosaic_0001>

<bundles_post_ra>
// kernel: tpu_custom_call.1
= control target key start
LH: loop header
LB: loop body
LE: loop exit
PB: predicated region body
PF: predicated region fallthrough
CT: control target
= control target key end

     0   :  { %8 = vsyncpa [#allocation3], 0  ;;  %s846_s0 = inlined_call_operand.hbm [shape: f32[2,4,256], index: 0, kind: input, shape index: {}]   ;;  %s847_s1 = inlined_call_operand.vmem [shape: f32[4,1], index: 1, kind: input, shape index: {}]   ;;  %s848_s2 = inlined_call_operand.vmem [shape: f32[1,4], index: 2, kind: input, shape index: {}]   ;;  %s849_s3 = inlined_call_operand.hbm [shape: f32[2,4,256], index: 3, kind: output, shape index: {}]  }
   0x1   :  { %10 = vsyncpa [#allocation3 + $0x1], 0 }
   0x2   :  { %11 = vsyncpa [#allocation4], 0 }
   0x3   :  { %13 = vsyncpa [#allocation4 + $0x1], 0  ;;  %s675_s12 = smov 0   ;;  %s677_s13 = smov 0  }
   0x4   :  { %s679_s14 = smov 0   ;;  %s681_s15 = smov 0  }
   0x5 LB: > { %s696_s16 = sadd.s32 4294967295, %s648_s15   ;;  %s468_s17 = sadd.s32 4294967294, %s648_s15   ;;  %s648_s15 = sphi %s681_s15, %s864_s15   ;;  %s644_s14 = sphi %s679_s14, %s863_s14   ;;  %s640_s13 = sphi %s677_s13, %s862_s13   ;;  %s636_s12 = sphi %s675_s12, %s861_s12  }
   0x6   : > { %s700_s18 = sadd.s32 1, %s648_s15   ;;  %s26_s19 = sadd.s32 1, %s644_s14 }
   0x7   : > { %s23_s20 = ssub.s32 %s648_s15, %s700_s18  ;;  %p33_p0 = scmp.ne.s32.totalorder %s644_s14, %s640_s13 }
   0x8   : > { %p24_p1 = scmp.eq.s32.totalorder %s23_s20, 0  ;;  %p34_p2 = scmp.eq.s32.totalorder %s648_s15, 0 }
   0x9   : > { %p39_p3 = scmp.ne.s32.totalorder %s640_s13, %s636_s12  ;;  %p40_p4 = scmp.eq.s32.totalorder %s696_s16, 0 }
   0xa   : > { %s712_s21 = scalar_select %p24_p1, %s644_s14, %s26_s19  }
   0xb   : > { %p714_p5 = por %p34_p2, %p33_p0  ;;  %p718_p6 = por %p40_p4, %p39_p3 }
   0xc   : > { %p105_p7 = scmp.eq.s32.totalorder %s696_s16, 1  ;;  %p111_p8 = scmp.eq.s32.totalorder %s468_s17, 1 }
   0xd   : > { %p514_p10 = scmp.lt.s32.totalorder %s648_s15, 2  ;;  %s137_s26 = sand.u32 1, %s644_s14  }
   0xe   : > { %p725_p11 = por %p105_p7, %p33_p0  ;;  %p729_p12 = por %p111_p8, %p39_p3 }
   0xf   : > { %s486_s27 = sshll.u32 %s648_s15, 7  ;;  %s471_s28 = sshll.u32 %s137_s26, 3 }
  0x10   : > { %s853_s24 = scalar_select %p725_p11, 1, 0 }
  0x11   : > { %s854_s25 = scalar_select %p729_p12, 1, 0 }
  0x12   : > { %s738_s4 = scalar_lea.hbm %s846_s0, %s486_s27  ;;  %s141_s5 = scalar_lea.vmem [#allocation2], %s471_s28 }
  0x13   : > { %s149_s6 = sshll.u32 %s141_s5, 4  ;;  %p742_p13 = pnand %p514_p10, %p714_p5  ;;  %s746_s6 = int_to_ptr.vmem [resolvable:$true] %s149_s6 }
  0x14   : > { %s138_s8 = scalar_lea.sflag [#allocation3], %s137_s26  ;;  %s552_s9 = scalar_lea.hbm %s738_s4, 128 }
  0x15   : > { %p553_p2 = scmp.ne.s32.totalorder %s738_s4, %s552_s9  ;;  %p554_p3 = pneg %p742_p13 }
  0x16   : > { %s557_s17 = scalar_lea.hbm %s846_s0, 256  ;;  %p558_p5 = scmp.lt.u32.totalorder %s738_s4, %s846_s0 }
  0x17   : > { %p555_p4 = pnand %p554_p3, %p553_p2  ;;  %p559_p8 = scmp.lt.u32.totalorder %s557_s17, %s552_s9 }
  0x18   : > { %p561_p9 = scmp.lt.u32.totalorder %s552_s9, %s738_s4 }
  0x19   : > { %p556_p7 = pneg %p555_p4  ;;  %p560_p10 = por %p559_p8, %p558_p5 }
  0x1b   : > { %p562_p0 = por %p561_p9, %p560_p10 }
  0x1d   : > { %p563_p1 = pnand %p562_p0, %p556_p7 }
  0x1f   : > { %566 = shalt.err (!%p563_p1)
}
  0x20   : > { %s567_s22 = scalar_lea.vmem %s746_s6, 128  ;;  %s650_s26 = smov [#allocation2]  }
  0x21   : > { %p568_p2 = scmp.ne.s32.totalorder %s746_s6, %s567_s22  ;;  %s572_s27 = sshll.u32 %s650_s26, 4  ;;  %s573_s27 = int_to_ptr.vmem [resolvable:$false] %s572_s27 }
  0x22   : > { %s574_s28 = scalar_lea.vmem %s573_s27, 256  ;;  %p575_p11 = scmp.lt.s32.totalorder %s746_s6, %s573_s27 }
  0x23   : > { %p570_p4 = pnand %p568_p2, %p554_p3  ;;  %p576_p5 = scmp.lt.s32.totalorder %s574_s28, %s567_s22 }
  0x25   : > { %p571_p12 = pneg %p570_p4  ;;  %p577_p8 = por %p576_p5, %p575_p11 }
  0x27   : > { %p578_p9 = pnand %p577_p8, %p571_p12 }
  0x29   : > { %581 = shalt.err (!%p578_p9)
}
  0x2a   : > { %509 = dma.hbm_to_vmem [thread:$0]  (!%p742_p13), %s738_s4, 128, %s746_s6, %s138_s8  }
  0x2b   : > { %p856_p0 = scmp.lt.s32.totalorder %s648_s15, 3  ;;  %p857_p1 = scmp.ge.s32.totalorder %s648_s15, 1 }
  0x2d   : > { %p155_p3 = pnand %p857_p1, %p856_p0 }
  0x2e   : > { %s780_s29 = sand.u32 (!%p155_p3), 1, %s640_s13  }
  0x2f   : > { %158 = sbr.rel (%p155_p3) target bundleno = 776 (0x308), region = 32  ;;  %s475_s30 = sshll.u32 (!%p155_p3), %s780_s29, 3 }
  0x30   : > { %s161_s5 = scalar_lea.sflag (!%p155_p3), [#allocation3], %s780_s29  ;;  %s164_s7 = scalar_lea.vmem (!%p155_p3), [#allocation2], %s475_s30 }
  0x36   : > { %627 = dma.done.wait (%p718_p6), %s161_s5, 128  }
  0x37   : > { %629 = vsyncadd (%p718_p6), %s161_s5, 4294967168  ;;  %vm191_vm0 = vcmask 1043456   ;;  %v187_v0 = vld [vmem:[%s164_s7] sm:$0xff]  ;;  %v651_v5 = vmov 0.0   ;;  %vm652_vm1 = vmmov 0   ;;  %v200_v7 = vlaneseq  ;;  %s487_s9 = sshll.u32 %s696_s16, 7 }
  0x38   : > { %v189_v1 = vcombine.high %v187_v0, %v187_v0  ;;  %v192_v2 = vsel %vm191_vm0, %v187_v0, 0.0  ;;  %492 = vmatprep.subr.mxu0 %v651_v5  ;;  %v198_v6 = vld [vmem:[%s847_s1] sm:$0xf]  ;;  %497 = vmatprep.subr.mxu1 %v651_v5  ;;  %vm206_vm2 = vcmask 31744   ;;  %vm288_vm3 = vcmask 1040384   ;;  %s186_s10 = scalar_lea.vmem [#allocation5], %s475_s30  ;;  %s802_s20 = scalar_lea.hbm %s849_s3, %s487_s9 }
  0x39   : > { %493 = vmatpush3.msk.msra.mxu0 %vm191_vm0, %v198_v6  ;;  %494 = vmatprep.mubr.msk.f32.mxu0 %vm652_vm1, %v651_v5  ;;  %v201_v8 = vand.u32 127, %v200_v7  ;;  %v203_v9 = vshrl.u32 %v200_v7, 7  ;;  %v283_v14 = vld [vmem:[%s848_s2] sm:$0x1]  ;;  %vm284_vm4 = vcmask 7168   ;;  %s398_s11 = sshll.u32 %s186_s10, 4  ;;  %s804_s11 = int_to_ptr.vmem [resolvable:$true] %s398_s11 }
  0x3a   : > { %v193_v3 = vsel %vm191_vm0, %v189_v1, 0.0  ;;  %499 = vmatprep.mubr.msk.f32.mxu1 %vm652_vm1, %v651_v5  ;;  %498 = vmatpush3.msk.msra.mxu1 %vm288_vm3, %v283_v14  ;;  %v653_v26 = vmov 839922192   ;;  %s384_s22 = scalar_lea.sflag [#allocation4], %s780_s29  ;;  %s582_s26 = scalar_lea.vmem %s804_s11, 128 }
  0x3b   : > { %v194_v4 = vadd.f32 %v193_v3, %v192_v2  ;;  %v204_v10 = vsub.s32 %v201_v8, %v203_v9  ;;  %v367_v23 = vsub.s32 0, %v203_v9  ;;  %v374_v27 = vunpack.c.l.s4 %v653_v26  ;;  %p583_p6 = scmp.ne.s32.totalorder %s804_s11, %s582_s26  ;;  %p858_p11 = scmp.ne.s32.totalorder %s853_s24, 0 }
  0x3c   : > { %s654_s16 = smov [#allocation5]  }
  0x3d   : > { %195 = vadd.xlane.f32.xlu0 %v194_v4  ;;  %v375_v28 = vunpack.c.0.s8 %v374_v27  ;;  %p584_p12 = pnand %p583_p6, %p858_p11  ;;  %s586_s27 = sshll.u32 %s654_s16, 4  ;;  %s587_s27 = int_to_ptr.vmem [resolvable:$false] %s586_s27 }
  0x3e   : > { %s588_s28 = scalar_lea.vmem %s587_s27, 256  ;;  %p589_p7 = scmp.lt.s32.totalorder %s804_s11, %s587_s27 }
  0x3f   : > { %v378_v29 = vsub.s32 %v375_v28, %v203_v9  ;;  %p585_p13 = pneg %p584_p12  ;;  %p590_p10 = scmp.lt.s32.totalorder %s588_s28, %s582_s26 }
  0x41   : > { %p591_p2 = por %p590_p10, %p589_p7 }
  0x43   : > { %p592_p4 = pnand %p591_p2, %p585_p13 }
  0xca   : > { %v196_v11 = vpop.xlane.xlu0 %195 }
  0xcb   : > { %v197_v12 = vmul.f32 0.00390625, %v196_v11 }
  0xcd   : > { %v205_v13 = vrot.slane %v197_v12, %v204_v10 }
  0xcf   : > { %495 = vmatmul.mubr.msk.f32.vlgmr.msra.gmra.mrb[0].mxu0 %vm206_vm2, %v205_v13 }
 0x1a2   : > { %v278_v15 = vpop.f32.mrb[0].mxu0 }
 0x1a3   : > { %v282_v16 = vmax.f32 %v278_v15, 0.0  ;;  %v496_v17 = vpop.f32.mrb[1].mxu0 }
 0x1a5   : > { %500 = vmatmul.mubr.msk.f32.vlgmr.msra.gmra.mrb[0].mxu1 %vm284_vm4, %v282_v16 }
 0x278   : > { %v358_v18 = vpop.f32.mrb[0].mxu1 }
 0x279   : > { %v359_v19 = vadd.f32 3.0, %v358_v18  ;;  %v501_v20 = vpop.f32.mrb[1].mxu1 }
 0x27b   : > { %v362_v21 = vmax.f32 %v359_v19, 0.0 }
 0x27d   : > { %v363_v22 = vmin.f32 %v362_v21, 6.0 }
 0x27f   : > { %v364_v24 = vmul.f32 0.16666667, %v363_v22 }
 0x281   : > { %v368_v25 = vrot.slane %v364_v24, %v367_v23 }
 0x283   : > { %370 = vbcast.lane.b32.xlu0 %v368_v25, 256 }
 0x2f5   : > { %v371_v30 = vpop.permute.xlu0 %370 }
 0x2f6   : > { %v379_v31 = vrot.slane %v371_v30, %v378_v29 }
 0x2f8   : > { %v381_v32 = vmul.f32 %v379_v31, %v187_v0 }
 0x2fa   : > { %382 = vst [vmem:[%s186_s10] sm:$0xff] %v381_v32 }
 0x2fb   : > { %595 = shalt.err (!%p592_p4)
}
 0x2fc   : > { %s596_s29 = scalar_lea.hbm %s802_s20, 128  ;;  %s600_s7 = scalar_lea.hbm %s849_s3, 256 }
 0x2fd   : > { %p597_p5 = scmp.ne.s32.totalorder %s802_s20, %s596_s29  ;;  %p601_p0 = scmp.lt.u32.totalorder %s802_s20, %s849_s3 }
 0x2fe   : > { %p602_p1 = scmp.lt.u32.totalorder %s600_s7, %s596_s29  ;;  %p604_p6 = scmp.lt.u32.totalorder %s596_s29, %s802_s20 }
 0x2ff   : > { %p598_p8 = pnand %p597_p5, %p858_p11 }
 0x300   : > { %p603_p3 = por %p602_p1, %p601_p0 }
 0x301   : > { %p599_p9 = pneg %p598_p8 }
 0x302   : > { %p605_p12 = por %p604_p6, %p603_p3 }
 0x304   : > { %p606_p13 = pnand %p605_p12, %p599_p9 }
 0x306   : > { %609 = shalt.err (!%p606_p13)
}
 0x307   : > { %504 = dma.vmem_to_hbm [thread:$0]  (%p858_p11), %s804_s11, 128, %s802_s20, %s384_s22  }
 0x308 PF: > { %s410_s23 = sand.u32 1, %s636_s12   ;;  %p859_p7 = scmp.ne.s32.totalorder %s854_s25, 0 }
 0x309   : > { %p860_p10 = scmp.ge.s32.totalorder %s648_s15, 2  ;;  %s411_s8 = scalar_lea.sflag [#allocation4], %s410_s23 }
 0x30b   : > { %p511_p2 = pnand %p860_p10, %p859_p7 }
 0x30d   : > { %631 = dma.done.wait (!%p511_p2), %s411_s8, 128  }
 0x30e   : > { %633 = vsyncadd (!%p511_p2), %s411_s8, 4294967168  ;;  %p16_p4 = scmp.ge.s32.totalorder %s700_s18, 4   ;;  %s861_s12 = smov %s640_s13 }
 0x30f   : > { %s862_s13 = smov %s644_s14  ;;  %s863_s14 = smov %s712_s21 }
 0x310   : > { %s864_s15 = smov %s700_s18  ;;  %18 = sbr.rel (!%p16_p4) target bundleno = 5 (0x5), region = 77 }
 0x317   :  { %416 = vsyncpa [#allocation3], 1 }
 0x318   :  { %418 = vsyncpa [#allocation3 + $0x1], 1 }
 0x319   :  { %419 = vsyncpa [#allocation4], 1 }
 0x31a   :  { %421 = vsyncpa [#allocation4 + $0x1], 1 }

</bundles_post_ra>
